<compile_context>
chip_gen: v5e
topology: v5e:2x2
jax: 0.10.0
libtpu: 0.0.40
codegen_flags: <defaults>
</compile_context>

<pallas_src>
import functools

import jax
import jax.numpy as jnp
from jax.experimental import pallas as pl
from jax.experimental.pallas import tpu as pltpu

LANE = 128


def _round_up(x, m):
    return ((x + m - 1) // m) * m


# ----------------------------- Pallas kernel --------------------------------
def stocha_policy_kernel(params_ref, x_ref, out_ref, *,
                         degree, obs_dim, act_dim, feat_dim,
                         min_log_std, max_log_std):
    D = obs_dim
    two_a = 2 * act_dim
    F = feat_dim

    # x_ref: (D, rows, 128) -- batch folded dense into (sublane, lane).
    rows = [x_ref[j].astype(jnp.float32) for j in range(D)]   # each (rows, 128)

    # Column offset of the degree-n monomial block inside the feature vector.
    offsets = []
    off = 0
    for n in range(1, degree + 1):
        offsets.append(off)
        off += D ** n

    acc = [None] * two_a          # fused [mean | log_std] accumulators per row

    def emit(col, slab):
        # acc[r] += W_fused[r, col] * slab, weight read as an SMEM scalar
        # (splats for free across the dense slab).
        for r in range(two_a):
            term = params_ref[r * F + col] * slab
            acc[r] = term if acc[r] is None else acc[r] + term

    def dfs(depth, flat, slab):
        # `slab` = x_{i1} * ... * x_{i_depth}; `flat` = its index within the
        # degree-`depth` block (i1 major ... i_depth minor, exactly torch's
        # matmul_crossing ordering).  The running product is shared by every
        # deeper monomial (memoized prefix products).
        emit(offsets[depth - 1] + flat, slab)
        if depth < degree:
            for j in range(D):
                dfs(depth + 1, flat * D + j, slab * rows[j])

    for i in range(D):
        dfs(1, i, rows[i])

    # Epilogue: add bias; clip + exp only on the log_std rows; one dense
    # (rows, 128) store per output row.
    for r in range(two_a):
        y = acc[r] + params_ref[two_a * F + r]
        if r >= act_dim:
            y = jnp.exp(jnp.clip(y, min_log_std, max_log_std))
        out_ref[r, :, :] = y.astype(out_ref.dtype)


# ------------------------------ parameter fusion ------------------------------
def fuse_params(w_mean, b_mean, w_log_std, b_log_std):
    """One-time (module init) fusion of the two linear heads.

    Returns a flat f32 vector [W_fused(2A,F) row-major | b_fused(2A,)] that
    lives in SMEM inside the kernel and is read as scalars.
    """
    w_fused_t = jnp.concatenate([w_mean, w_log_std], axis=1).T      # (2A, F)
    b_fused = jnp.concatenate([b_mean, b_log_std], axis=0)          # (2A,)
    return jnp.concatenate([w_fused_t.reshape(-1), b_fused]).astype(jnp.float32)


# ------------------------------ tiling policy --------------------------------
def _choose_tiling(B):
    """Pick (rows_per_tile, grid) for the sublane-folded batch layout.

    The batch is padded to a multiple of 128 lanes only; rows_per_tile is then
    chosen so that (a) tiles are large (up to 32K batch elements) to amortize
    per-grid-step overhead, (b) the grid is >= 2 for batches above ~8K so both
    v7x TensorCores get work, and (c) padding stays bounded (< ~8 extra
    sublane-rows per tile) instead of rounding B up to a whole huge tile.
    """
    r = _round_up(B, LANE) // LANE          # number of 128-wide column groups
    max_rows = 256                          # 256 * 128 = 32768 batch elems/tile
    if r <= 64:                             # <= 8192 elements: one grid step
        return r, 1
    n_tiles = max(2, -(-r // max_rows))
    rows = _round_up(-(-r // n_tiles), 8)
    n_tiles = -(-r // rows)
    return rows, n_tiles


# ------------------------------ JAX wrappers ----------------------------------
def stocha_policy_forward_t(obs_t, params_flat, *, degree, obs_dim, act_dim,
                            min_log_std, max_log_std):
    """Optimized entry: obs_t is (obs_dim, B); returns (2*act_dim, B).

    This transposed layout is the preferred production contract (no per-call
    HBM transpose); `stocha_policy_forward` adapts the torch layout on top.
    """
    D, B = obs_t.shape
    two_a = 2 * act_dim
    feat_dim = sum(obs_dim ** n for n in range(1, degree + 1))

    rows_per_tile, grid = _choose_tiling(B)
    padded_b = rows_per_tile * grid * LANE
    if padded_b != B:
        obs_t = jnp.pad(obs_t, ((0, 0), (0, padded_b - B)))
    # Free (row-major) reshape: fold batch into (sublane, lane) groups so every
    # kernel operand is a dense (rows, 128) slab.
    x3 = obs_t.reshape(D, padded_b // LANE, LANE)

    kernel = functools.partial(
        stocha_policy_kernel,
        degree=degree, obs_dim=obs_dim, act_dim=act_dim, feat_dim=feat_dim,
        min_log_std=min_log_std, max_log_std=max_log_std)

    out3 = pl.pallas_call(
        kernel,
        out_shape=jax.ShapeDtypeStruct((two_a, padded_b // LANE, LANE),
                                       jnp.float32),
        grid_spec=pltpu.PrefetchScalarGridSpec(
            num_scalar_prefetch=0,
            grid=(grid,),
            in_specs=[
                # Fused weights + biases: tiny, flat, SMEM-resident scalars.
                pl.BlockSpec(memory_space=pltpu.MemorySpace.SMEM),
                # Batch tile of obs, sublane-folded.
                pl.BlockSpec((D, rows_per_tile, LANE), lambda i: (0, i, 0)),
            ],
            out_specs=pl.BlockSpec((two_a, rows_per_tile, LANE),
                                   lambda i: (0, i, 0)),
        ),
        compiler_params=pltpu.CompilerParams(
            dimension_semantics=("parallel",)),
    )(params_flat, x3)

    # Free merge of (sublane, lane) back into the batch axis, then slice.
    return out3.reshape(two_a, padded_b)[:, :B]


def stocha_policy_forward(obs, params_flat, **kwargs):
    """Torch-contract adapter: (B, obs_dim) -> (B, 2*act_dim).

    The two transposes here are pure layout plumbing for the demo; in
    production keep activations in (obs_dim, B) layout and call
    stocha_policy_forward_t directly.  Output is sliced before transposing.
    """
    return stocha_policy_forward_t(obs.T, params_flat, **kwargs).T


# ----------------------- pure-JAX reference (for check) ----------------------
def make_features_ref(x, degree):
    terms = []
    a = x
    for n in range(1, degree + 1):
        if n > 1:
            a = (a[:, :, None] * x[:, None, :]).reshape(x.shape[0], -1)
        terms.append(a)
    return jnp.concatenate(terms, axis=-1)


def stocha_policy_ref(obs, w_mean, b_mean, w_log_std, b_log_std, *,
                      degree, min_log_std, max_log_std):
    feat = make_features_ref(obs, degree)
    mean = (feat[:, :, None] * w_mean[None, :, :]).sum(axis=1) + b_mean
    log_std = (feat[:, :, None] * w_log_std[None, :, :]).sum(axis=1) + b_log_std
    log_std = jnp.clip(log_std, min_log_std, max_log_std)
    return jnp.concatenate([mean, jnp.exp(log_std)], axis=-1)


# ---------------------------------- main -------------------------------------
if __name__ == "__main__":
    obs_dim = 4
    act_dim = 2
    degree = 2
    min_log_std = -20.0
    max_log_std = 2.0
    feat_dim = sum(obs_dim ** n for n in range(1, degree + 1))  # == get_features_dim

    key = jax.random.PRNGKey(0)
    k_obs, k_wm, k_bm, k_ws, k_bs, k_obs2 = jax.random.split(key, 6)

    # nn.Linear parameters stored transposed as (in_features, out_features).
    w_mean = 0.1 * jax.random.normal(k_wm, (feat_dim, act_dim), jnp.float32)
    b_mean = 0.1 * jax.random.normal(k_bm, (act_dim,), jnp.float32)
    w_log_std = 0.1 * jax.random.normal(k_ws, (feat_dim, act_dim), jnp.float32)
    b_log_std = 0.1 * jax.random.normal(k_bs, (act_dim,), jnp.float32)
    # TODO(synk): act_high_lim / act_low_lim buffers are registered in __init__
    # but unused in forward(), so they are intentionally omitted here.

    # Fuse + flatten parameters once at "init" (out of the per-call path).
    params_flat = fuse_params(w_mean, b_mean, w_log_std, b_log_std)

    # Small check: single tile, partial 128-lane group.
    batch = 8
    obs = jax.random.normal(k_obs, (batch, obs_dim), jnp.float32)
    out = stocha_policy_forward(
        obs, params_flat, degree=degree, obs_dim=obs_dim, act_dim=act_dim,
        min_log_std=min_log_std, max_log_std=max_log_std)
    out = jax.block_until_ready(out)
    ref = stocha_policy_ref(
        obs, w_mean, b_mean, w_log_std, b_log_std,
        degree=degree, min_log_std=min_log_std, max_log_std=max_log_std)
    assert out.shape == (batch, 2 * act_dim), out.shape
    assert jnp.allclose(out, ref, atol=1e-5, rtol=1e-5)

    # Multi-tile check: grid=2 with bounded padding; the "parallel" batch axis
    # shards across both TensorCores on v7x.
    batch2 = 8200
    obs2 = jax.random.normal(k_obs2, (batch2, obs_dim), jnp.float32)
    out2 = jax.block_until_ready(stocha_policy_forward(
        obs2, params_flat, degree=degree, obs_dim=obs_dim, act_dim=act_dim,
        min_log_std=min_log_std, max_log_std=max_log_std))
    ref2 = stocha_policy_ref(
        obs2, w_mean, b_mean, w_log_std, b_log_std,
        degree=degree, min_log_std=min_log_std, max_log_std=max_log_std)
    assert out2.shape == (batch2, 2 * act_dim), out2.shape
    assert jnp.allclose(out2, ref2, atol=1e-5, rtol=1e-5)

    print("KERNEL_OK")
</pallas_src>

<mosaic_0001>
module attributes {stable_mosaic.version = 11 : i64} {
  func.func @stocha_policy_kernel(%arg0: i32, %arg1: memref<84xf32, #tpu.memory_space<smem>>, %arg2: memref<4x1x128xf32, #tpu.memory_space<vmem>>, %arg3: memref<4x1x128xf32, #tpu.memory_space<vmem>>) attributes {dimension_semantics = [#tpu.dimension_semantics<parallel>], iteration_bounds = array<i64: 1>, scalar_prefetch = 0 : i64, scratch_operands = 0 : i64, tpu.core_type = #tpu.core_type<tc>, window_params = [{transform_indices = @transform_0, window_bounds = array<i64: 84>}, {transform_indices = @transform_1, window_bounds = array<i64: 4, 1, 128>}, {transform_indices = @transform_2, window_bounds = array<i64: 4, 1, 128>}]} {
    %c0 = arith.constant 0 : index
    %c0_0 = arith.constant 0 : index
    %c0_1 = arith.constant 0 : index
    %0 = vector.load %arg2[%c0, %c0_0, %c0_1] : memref<4x1x128xf32, #tpu.memory_space<vmem>>, vector<1x1x128xf32>
    %1 = vector.shape_cast %0 : vector<1x1x128xf32> to vector<1x128xf32>
    %c1 = arith.constant 1 : index
    %c0_2 = arith.constant 0 : index
    %c0_3 = arith.constant 0 : index
    %2 = vector.load %arg2[%c1, %c0_2, %c0_3] : memref<4x1x128xf32, #tpu.memory_space<vmem>>, vector<1x1x128xf32>
    %3 = vector.shape_cast %2 : vector<1x1x128xf32> to vector<1x128xf32>
    %c2 = arith.constant 2 : index
    %c0_4 = arith.constant 0 : index
    %c0_5 = arith.constant 0 : index
    %4 = vector.load %arg2[%c2, %c0_4, %c0_5] : memref<4x1x128xf32, #tpu.memory_space<vmem>>, vector<1x1x128xf32>
    %5 = vector.shape_cast %4 : vector<1x1x128xf32> to vector<1x128xf32>
    %c3 = arith.constant 3 : index
    %c0_6 = arith.constant 0 : index
    %c0_7 = arith.constant 0 : index
    %6 = vector.load %arg2[%c3, %c0_6, %c0_7] : memref<4x1x128xf32, #tpu.memory_space<vmem>>, vector<1x1x128xf32>
    %7 = vector.shape_cast %6 : vector<1x1x128xf32> to vector<1x128xf32>
    %c0_8 = arith.constant 0 : index
    %8 = memref.load %arg1[%c0_8] : memref<84xf32, #tpu.memory_space<smem>>
    %9 = vector.broadcast %8 : f32 to vector<1x128xf32>
    %10 = arith.mulf %9, %1 : vector<1x128xf32>
    %c20 = arith.constant 20 : index
    %11 = memref.load %arg1[%c20] : memref<84xf32, #tpu.memory_space<smem>>
    %12 = vector.broadcast %11 : f32 to vector<1x128xf32>
    %13 = arith.mulf %12, %1 : vector<1x128xf32>
    %c40 = arith.constant 40 : index
    %14 = memref.load %arg1[%c40] : memref<84xf32, #tpu.memory_space<smem>>
    %15 = vector.broadcast %14 : f32 to vector<1x128xf32>
    %16 = arith.mulf %15, %1 : vector<1x128xf32>
    %c60 = arith.constant 60 : index
    %17 = memref.load %arg1[%c60] : memref<84xf32, #tpu.memory_space<smem>>
    %18 = vector.broadcast %17 : f32 to vector<1x128xf32>
    %19 = arith.mulf %18, %1 : vector<1x128xf32>
    %20 = arith.mulf %1, %1 : vector<1x128xf32>
    %c4 = arith.constant 4 : index
    %21 = memref.load %arg1[%c4] : memref<84xf32, #tpu.memory_space<smem>>
    %22 = vector.broadcast %21 : f32 to vector<1x128xf32>
    %23 = arith.mulf %22, %20 : vector<1x128xf32>
    %24 = arith.addf %10, %23 : vector<1x128xf32>
    %c24 = arith.constant 24 : index
    %25 = memref.load %arg1[%c24] : memref<84xf32, #tpu.memory_space<smem>>
    %26 = vector.broadcast %25 : f32 to vector<1x128xf32>
    %27 = arith.mulf %26, %20 : vector<1x128xf32>
    %28 = arith.addf %13, %27 : vector<1x128xf32>
    %c44 = arith.constant 44 : index
    %29 = memref.load %arg1[%c44] : memref<84xf32, #tpu.memory_space<smem>>
    %30 = vector.broadcast %29 : f32 to vector<1x128xf32>
    %31 = arith.mulf %30, %20 : vector<1x128xf32>
    %32 = arith.addf %16, %31 : vector<1x128xf32>
    %c64 = arith.constant 64 : index
    %33 = memref.load %arg1[%c64] : memref<84xf32, #tpu.memory_space<smem>>
    %34 = vector.broadcast %33 : f32 to vector<1x128xf32>
    %35 = arith.mulf %34, %20 : vector<1x128xf32>
    %36 = arith.addf %19, %35 : vector<1x128xf32>
    %37 = arith.mulf %1, %3 : vector<1x128xf32>
    %c5 = arith.constant 5 : index
    %38 = memref.load %arg1[%c5] : memref<84xf32, #tpu.memory_space<smem>>
    %39 = vector.broadcast %38 : f32 to vector<1x128xf32>
    %40 = arith.mulf %39, %37 : vector<1x128xf32>
    %41 = arith.addf %24, %40 : vector<1x128xf32>
    %c25 = arith.constant 25 : index
    %42 = memref.load %arg1[%c25] : memref<84xf32, #tpu.memory_space<smem>>
    %43 = vector.broadcast %42 : f32 to vector<1x128xf32>
    %44 = arith.mulf %43, %37 : vector<1x128xf32>
    %45 = arith.addf %28, %44 : vector<1x128xf32>
    %c45 = arith.constant 45 : index
    %46 = memref.load %arg1[%c45] : memref<84xf32, #tpu.memory_space<smem>>
    %47 = vector.broadcast %46 : f32 to vector<1x128xf32>
    %48 = arith.mulf %47, %37 : vector<1x128xf32>
    %49 = arith.addf %32, %48 : vector<1x128xf32>
    %c65 = arith.constant 65 : index
    %50 = memref.load %arg1[%c65] : memref<84xf32, #tpu.memory_space<smem>>
    %51 = vector.broadcast %50 : f32 to vector<1x128xf32>
    %52 = arith.mulf %51, %37 : vector<1x128xf32>
    %53 = arith.addf %36, %52 : vector<1x128xf32>
    %54 = arith.mulf %1, %5 : vector<1x128xf32>
    %c6 = arith.constant 6 : index
    %55 = memref.load %arg1[%c6] : memref<84xf32, #tpu.memory_space<smem>>
    %56 = vector.broadcast %55 : f32 to vector<1x128xf32>
    %57 = arith.mulf %56, %54 : vector<1x128xf32>
    %58 = arith.addf %41, %57 : vector<1x128xf32>
    %c26 = arith.constant 26 : index
    %59 = memref.load %arg1[%c26] : memref<84xf32, #tpu.memory_space<smem>>
    %60 = vector.broadcast %59 : f32 to vector<1x128xf32>
    %61 = arith.mulf %60, %54 : vector<1x128xf32>
    %62 = arith.addf %45, %61 : vector<1x128xf32>
    %c46 = arith.constant 46 : index
    %63 = memref.load %arg1[%c46] : memref<84xf32, #tpu.memory_space<smem>>
    %64 = vector.broadcast %63 : f32 to vector<1x128xf32>
    %65 = arith.mulf %64, %54 : vector<1x128xf32>
    %66 = arith.addf %49, %65 : vector<1x128xf32>
    %c66 = arith.constant 66 : index
    %67 = memref.load %arg1[%c66] : memref<84xf32, #tpu.memory_space<smem>>
    %68 = vector.broadcast %67 : f32 to vector<1x128xf32>
    %69 = arith.mulf %68, %54 : vector<1x128xf32>
    %70 = arith.addf %53, %69 : vector<1x128xf32>
    %71 = arith.mulf %1, %7 : vector<1x128xf32>
    %c7 = arith.constant 7 : index
    %72 = memref.load %arg1[%c7] : memref<84xf32, #tpu.memory_space<smem>>
    %73 = vector.broadcast %72 : f32 to vector<1x128xf32>
    %74 = arith.mulf %73, %71 : vector<1x128xf32>
    %75 = arith.addf %58, %74 : vector<1x128xf32>
    %c27 = arith.constant 27 : index
    %76 = memref.load %arg1[%c27] : memref<84xf32, #tpu.memory_space<smem>>
    %77 = vector.broadcast %76 : f32 to vector<1x128xf32>
    %78 = arith.mulf %77, %71 : vector<1x128xf32>
    %79 = arith.addf %62, %78 : vector<1x128xf32>
    %c47 = arith.constant 47 : index
    %80 = memref.load %arg1[%c47] : memref<84xf32, #tpu.memory_space<smem>>
    %81 = vector.broadcast %80 : f32 to vector<1x128xf32>
    %82 = arith.mulf %81, %71 : vector<1x128xf32>
    %83 = arith.addf %66, %82 : vector<1x128xf32>
    %c67 = arith.constant 67 : index
    %84 = memref.load %arg1[%c67] : memref<84xf32, #tpu.memory_space<smem>>
    %85 = vector.broadcast %84 : f32 to vector<1x128xf32>
    %86 = arith.mulf %85, %71 : vector<1x128xf32>
    %87 = arith.addf %70, %86 : vector<1x128xf32>
    %c1_9 = arith.constant 1 : index
    %88 = memref.load %arg1[%c1_9] : memref<84xf32, #tpu.memory_space<smem>>
    %89 = vector.broadcast %88 : f32 to vector<1x128xf32>
    %90 = arith.mulf %89, %3 : vector<1x128xf32>
    %91 = arith.addf %75, %90 : vector<1x128xf32>
    %c21 = arith.constant 21 : index
    %92 = memref.load %arg1[%c21] : memref<84xf32, #tpu.memory_space<smem>>
    %93 = vector.broadcast %92 : f32 to vector<1x128xf32>
    %94 = arith.mulf %93, %3 : vector<1x128xf32>
    %95 = arith.addf %79, %94 : vector<1x128xf32>
    %c41 = arith.constant 41 : index
    %96 = memref.load %arg1[%c41] : memref<84xf32, #tpu.memory_space<smem>>
    %97 = vector.broadcast %96 : f32 to vector<1x128xf32>
    %98 = arith.mulf %97, %3 : vector<1x128xf32>
    %99 = arith.addf %83, %98 : vector<1x128xf32>
    %c61 = arith.constant 61 : index
    %100 = memref.load %arg1[%c61] : memref<84xf32, #tpu.memory_space<smem>>
    %101 = vector.broadcast %100 : f32 to vector<1x128xf32>
    %102 = arith.mulf %101, %3 : vector<1x128xf32>
    %103 = arith.addf %87, %102 : vector<1x128xf32>
    %104 = arith.mulf %3, %1 : vector<1x128xf32>
    %c8 = arith.constant 8 : index
    %105 = memref.load %arg1[%c8] : memref<84xf32, #tpu.memory_space<smem>>
    %106 = vector.broadcast %105 : f32 to vector<1x128xf32>
    %107 = arith.mulf %106, %104 : vector<1x128xf32>
    %108 = arith.addf %91, %107 : vector<1x128xf32>
    %c28 = arith.constant 28 : index
    %109 = memref.load %arg1[%c28] : memref<84xf32, #tpu.memory_space<smem>>
    %110 = vector.broadcast %109 : f32 to vector<1x128xf32>
    %111 = arith.mulf %110, %104 : vector<1x128xf32>
    %112 = arith.addf %95, %111 : vector<1x128xf32>
    %c48 = arith.constant 48 : index
    %113 = memref.load %arg1[%c48] : memref<84xf32, #tpu.memory_space<smem>>
    %114 = vector.broadcast %113 : f32 to vector<1x128xf32>
    %115 = arith.mulf %114, %104 : vector<1x128xf32>
    %116 = arith.addf %99, %115 : vector<1x128xf32>
    %c68 = arith.constant 68 : index
    %117 = memref.load %arg1[%c68] : memref<84xf32, #tpu.memory_space<smem>>
    %118 = vector.broadcast %117 : f32 to vector<1x128xf32>
    %119 = arith.mulf %118, %104 : vector<1x128xf32>
    %120 = arith.addf %103, %119 : vector<1x128xf32>
    %121 = arith.mulf %3, %3 : vector<1x128xf32>
    %c9 = arith.constant 9 : index
    %122 = memref.load %arg1[%c9] : memref<84xf32, #tpu.memory_space<smem>>
    %123 = vector.broadcast %122 : f32 to vector<1x128xf32>
    %124 = arith.mulf %123, %121 : vector<1x128xf32>
    %125 = arith.addf %108, %124 : vector<1x128xf32>
    %c29 = arith.constant 29 : index
    %126 = memref.load %arg1[%c29] : memref<84xf32, #tpu.memory_space<smem>>
    %127 = vector.broadcast %126 : f32 to vector<1x128xf32>
    %128 = arith.mulf %127, %121 : vector<1x128xf32>
    %129 = arith.addf %112, %128 : vector<1x128xf32>
    %c49 = arith.constant 49 : index
    %130 = memref.load %arg1[%c49] : memref<84xf32, #tpu.memory_space<smem>>
    %131 = vector.broadcast %130 : f32 to vector<1x128xf32>
    %132 = arith.mulf %131, %121 : vector<1x128xf32>
    %133 = arith.addf %116, %132 : vector<1x128xf32>
    %c69 = arith.constant 69 : index
    %134 = memref.load %arg1[%c69] : memref<84xf32, #tpu.memory_space<smem>>
    %135 = vector.broadcast %134 : f32 to vector<1x128xf32>
    %136 = arith.mulf %135, %121 : vector<1x128xf32>
    %137 = arith.addf %120, %136 : vector<1x128xf32>
    %138 = arith.mulf %3, %5 : vector<1x128xf32>
    %c10 = arith.constant 10 : index
    %139 = memref.load %arg1[%c10] : memref<84xf32, #tpu.memory_space<smem>>
    %140 = vector.broadcast %139 : f32 to vector<1x128xf32>
    %141 = arith.mulf %140, %138 : vector<1x128xf32>
    %142 = arith.addf %125, %141 : vector<1x128xf32>
    %c30 = arith.constant 30 : index
    %143 = memref.load %arg1[%c30] : memref<84xf32, #tpu.memory_space<smem>>
    %144 = vector.broadcast %143 : f32 to vector<1x128xf32>
    %145 = arith.mulf %144, %138 : vector<1x128xf32>
    %146 = arith.addf %129, %145 : vector<1x128xf32>
    %c50 = arith.constant 50 : index
    %147 = memref.load %arg1[%c50] : memref<84xf32, #tpu.memory_space<smem>>
    %148 = vector.broadcast %147 : f32 to vector<1x128xf32>
    %149 = arith.mulf %148, %138 : vector<1x128xf32>
    %150 = arith.addf %133, %149 : vector<1x128xf32>
    %c70 = arith.constant 70 : index
    %151 = memref.load %arg1[%c70] : memref<84xf32, #tpu.memory_space<smem>>
    %152 = vector.broadcast %151 : f32 to vector<1x128xf32>
    %153 = arith.mulf %152, %138 : vector<1x128xf32>
    %154 = arith.addf %137, %153 : vector<1x128xf32>
    %155 = arith.mulf %3, %7 : vector<1x128xf32>
    %c11 = arith.constant 11 : index
    %156 = memref.load %arg1[%c11] : memref<84xf32, #tpu.memory_space<smem>>
    %157 = vector.broadcast %156 : f32 to vector<1x128xf32>
    %158 = arith.mulf %157, %155 : vector<1x128xf32>
    %159 = arith.addf %142, %158 : vector<1x128xf32>
    %c31 = arith.constant 31 : index
    %160 = memref.load %arg1[%c31] : memref<84xf32, #tpu.memory_space<smem>>
    %161 = vector.broadcast %160 : f32 to vector<1x128xf32>
    %162 = arith.mulf %161, %155 : vector<1x128xf32>
    %163 = arith.addf %146, %162 : vector<1x128xf32>
    %c51 = arith.constant 51 : index
    %164 = memref.load %arg1[%c51] : memref<84xf32, #tpu.memory_space<smem>>
    %165 = vector.broadcast %164 : f32 to vector<1x128xf32>
    %166 = arith.mulf %165, %155 : vector<1x128xf32>
    %167 = arith.addf %150, %166 : vector<1x128xf32>
    %c71 = arith.constant 71 : index
    %168 = memref.load %arg1[%c71] : memref<84xf32, #tpu.memory_space<smem>>
    %169 = vector.broadcast %168 : f32 to vector<1x128xf32>
    %170 = arith.mulf %169, %155 : vector<1x128xf32>
    %171 = arith.addf %154, %170 : vector<1x128xf32>
    %c2_10 = arith.constant 2 : index
    %172 = memref.load %arg1[%c2_10] : memref<84xf32, #tpu.memory_space<smem>>
    %173 = vector.broadcast %172 : f32 to vector<1x128xf32>
    %174 = arith.mulf %173, %5 : vector<1x128xf32>
    %175 = arith.addf %159, %174 : vector<1x128xf32>
    %c22 = arith.constant 22 : index
    %176 = memref.load %arg1[%c22] : memref<84xf32, #tpu.memory_space<smem>>
    %177 = vector.broadcast %176 : f32 to vector<1x128xf32>
    %178 = arith.mulf %177, %5 : vector<1x128xf32>
    %179 = arith.addf %163, %178 : vector<1x128xf32>
    %c42 = arith.constant 42 : index
    %180 = memref.load %arg1[%c42] : memref<84xf32, #tpu.memory_space<smem>>
    %181 = vector.broadcast %180 : f32 to vector<1x128xf32>
    %182 = arith.mulf %181, %5 : vector<1x128xf32>
    %183 = arith.addf %167, %182 : vector<1x128xf32>
    %c62 = arith.constant 62 : index
    %184 = memref.load %arg1[%c62] : memref<84xf32, #tpu.memory_space<smem>>
    %185 = vector.broadcast %184 : f32 to vector<1x128xf32>
    %186 = arith.mulf %185, %5 : vector<1x128xf32>
    %187 = arith.addf %171, %186 : vector<1x128xf32>
    %188 = arith.mulf %5, %1 : vector<1x128xf32>
    %c12 = arith.constant 12 : index
    %189 = memref.load %arg1[%c12] : memref<84xf32, #tpu.memory_space<smem>>
    %190 = vector.broadcast %189 : f32 to vector<1x128xf32>
    %191 = arith.mulf %190, %188 : vector<1x128xf32>
    %192 = arith.addf %175, %191 : vector<1x128xf32>
    %c32 = arith.constant 32 : index
    %193 = memref.load %arg1[%c32] : memref<84xf32, #tpu.memory_space<smem>>
    %194 = vector.broadcast %193 : f32 to vector<1x128xf32>
    %195 = arith.mulf %194, %188 : vector<1x128xf32>
    %196 = arith.addf %179, %195 : vector<1x128xf32>
    %c52 = arith.constant 52 : index
    %197 = memref.load %arg1[%c52] : memref<84xf32, #tpu.memory_space<smem>>
    %198 = vector.broadcast %197 : f32 to vector<1x128xf32>
    %199 = arith.mulf %198, %188 : vector<1x128xf32>
    %200 = arith.addf %183, %199 : vector<1x128xf32>
    %c72 = arith.constant 72 : index
    %201 = memref.load %arg1[%c72] : memref<84xf32, #tpu.memory_space<smem>>
    %202 = vector.broadcast %201 : f32 to vector<1x128xf32>
    %203 = arith.mulf %202, %188 : vector<1x128xf32>
    %204 = arith.addf %187, %203 : vector<1x128xf32>
    %205 = arith.mulf %5, %3 : vector<1x128xf32>
    %c13 = arith.constant 13 : index
    %206 = memref.load %arg1[%c13] : memref<84xf32, #tpu.memory_space<smem>>
    %207 = vector.broadcast %206 : f32 to vector<1x128xf32>
    %208 = arith.mulf %207, %205 : vector<1x128xf32>
    %209 = arith.addf %192, %208 : vector<1x128xf32>
    %c33 = arith.constant 33 : index
    %210 = memref.load %arg1[%c33] : memref<84xf32, #tpu.memory_space<smem>>
    %211 = vector.broadcast %210 : f32 to vector<1x128xf32>
    %212 = arith.mulf %211, %205 : vector<1x128xf32>
    %213 = arith.addf %196, %212 : vector<1x128xf32>
    %c53 = arith.constant 53 : index
    %214 = memref.load %arg1[%c53] : memref<84xf32, #tpu.memory_space<smem>>
    %215 = vector.broadcast %214 : f32 to vector<1x128xf32>
    %216 = arith.mulf %215, %205 : vector<1x128xf32>
    %217 = arith.addf %200, %216 : vector<1x128xf32>
    %c73 = arith.constant 73 : index
    %218 = memref.load %arg1[%c73] : memref<84xf32, #tpu.memory_space<smem>>
    %219 = vector.broadcast %218 : f32 to vector<1x128xf32>
    %220 = arith.mulf %219, %205 : vector<1x128xf32>
    %221 = arith.addf %204, %220 : vector<1x128xf32>
    %222 = arith.mulf %5, %5 : vector<1x128xf32>
    %c14 = arith.constant 14 : index
    %223 = memref.load %arg1[%c14] : memref<84xf32, #tpu.memory_space<smem>>
    %224 = vector.broadcast %223 : f32 to vector<1x128xf32>
    %225 = arith.mulf %224, %222 : vector<1x128xf32>
    %226 = arith.addf %209, %225 : vector<1x128xf32>
    %c34 = arith.constant 34 : index
    %227 = memref.load %arg1[%c34] : memref<84xf32, #tpu.memory_space<smem>>
    %228 = vector.broadcast %227 : f32 to vector<1x128xf32>
    %229 = arith.mulf %228, %222 : vector<1x128xf32>
    %230 = arith.addf %213, %229 : vector<1x128xf32>
    %c54 = arith.constant 54 : index
    %231 = memref.load %arg1[%c54] : memref<84xf32, #tpu.memory_space<smem>>
    %232 = vector.broadcast %231 : f32 to vector<1x128xf32>
    %233 = arith.mulf %232, %222 : vector<1x128xf32>
    %234 = arith.addf %217, %233 : vector<1x128xf32>
    %c74 = arith.constant 74 : index
    %235 = memref.load %arg1[%c74] : memref<84xf32, #tpu.memory_space<smem>>
    %236 = vector.broadcast %235 : f32 to vector<1x128xf32>
    %237 = arith.mulf %236, %222 : vector<1x128xf32>
    %238 = arith.addf %221, %237 : vector<1x128xf32>
    %239 = arith.mulf %5, %7 : vector<1x128xf32>
    %c15 = arith.constant 15 : index
    %240 = memref.load %arg1[%c15] : memref<84xf32, #tpu.memory_space<smem>>
    %241 = vector.broadcast %240 : f32 to vector<1x128xf32>
    %242 = arith.mulf %241, %239 : vector<1x128xf32>
    %243 = arith.addf %226, %242 : vector<1x128xf32>
    %c35 = arith.constant 35 : index
    %244 = memref.load %arg1[%c35] : memref<84xf32, #tpu.memory_space<smem>>
    %245 = vector.broadcast %244 : f32 to vector<1x128xf32>
    %246 = arith.mulf %245, %239 : vector<1x128xf32>
    %247 = arith.addf %230, %246 : vector<1x128xf32>
    %c55 = arith.constant 55 : index
    %248 = memref.load %arg1[%c55] : memref<84xf32, #tpu.memory_space<smem>>
    %249 = vector.broadcast %248 : f32 to vector<1x128xf32>
    %250 = arith.mulf %249, %239 : vector<1x128xf32>
    %251 = arith.addf %234, %250 : vector<1x128xf32>
    %c75 = arith.constant 75 : index
    %252 = memref.load %arg1[%c75] : memref<84xf32, #tpu.memory_space<smem>>
    %253 = vector.broadcast %252 : f32 to vector<1x128xf32>
    %254 = arith.mulf %253, %239 : vector<1x128xf32>
    %255 = arith.addf %238, %254 : vector<1x128xf32>
    %c3_11 = arith.constant 3 : index
    %256 = memref.load %arg1[%c3_11] : memref<84xf32, #tpu.memory_space<smem>>
    %257 = vector.broadcast %256 : f32 to vector<1x128xf32>
    %258 = arith.mulf %257, %7 : vector<1x128xf32>
    %259 = arith.addf %243, %258 : vector<1x128xf32>
    %c23 = arith.constant 23 : index
    %260 = memref.load %arg1[%c23] : memref<84xf32, #tpu.memory_space<smem>>
    %261 = vector.broadcast %260 : f32 to vector<1x128xf32>
    %262 = arith.mulf %261, %7 : vector<1x128xf32>
    %263 = arith.addf %247, %262 : vector<1x128xf32>
    %c43 = arith.constant 43 : index
    %264 = memref.load %arg1[%c43] : memref<84xf32, #tpu.memory_space<smem>>
    %265 = vector.broadcast %264 : f32 to vector<1x128xf32>
    %266 = arith.mulf %265, %7 : vector<1x128xf32>
    %267 = arith.addf %251, %266 : vector<1x128xf32>
    %c63 = arith.constant 63 : index
    %268 = memref.load %arg1[%c63] : memref<84xf32, #tpu.memory_space<smem>>
    %269 = vector.broadcast %268 : f32 to vector<1x128xf32>
    %270 = arith.mulf %269, %7 : vector<1x128xf32>
    %271 = arith.addf %255, %270 : vector<1x128xf32>
    %272 = arith.mulf %7, %1 : vector<1x128xf32>
    %c16 = arith.constant 16 : index
    %273 = memref.load %arg1[%c16] : memref<84xf32, #tpu.memory_space<smem>>
    %274 = vector.broadcast %273 : f32 to vector<1x128xf32>
    %275 = arith.mulf %274, %272 : vector<1x128xf32>
    %276 = arith.addf %259, %275 : vector<1x128xf32>
    %c36 = arith.constant 36 : index
    %277 = memref.load %arg1[%c36] : memref<84xf32, #tpu.memory_space<smem>>
    %278 = vector.broadcast %277 : f32 to vector<1x128xf32>
    %279 = arith.mulf %278, %272 : vector<1x128xf32>
    %280 = arith.addf %263, %279 : vector<1x128xf32>
    %c56 = arith.constant 56 : index
    %281 = memref.load %arg1[%c56] : memref<84xf32, #tpu.memory_space<smem>>
    %282 = vector.broadcast %281 : f32 to vector<1x128xf32>
    %283 = arith.mulf %282, %272 : vector<1x128xf32>
    %284 = arith.addf %267, %283 : vector<1x128xf32>
    %c76 = arith.constant 76 : index
    %285 = memref.load %arg1[%c76] : memref<84xf32, #tpu.memory_space<smem>>
    %286 = vector.broadcast %285 : f32 to vector<1x128xf32>
    %287 = arith.mulf %286, %272 : vector<1x128xf32>
    %288 = arith.addf %271, %287 : vector<1x128xf32>
    %289 = arith.mulf %7, %3 : vector<1x128xf32>
    %c17 = arith.constant 17 : index
    %290 = memref.load %arg1[%c17] : memref<84xf32, #tpu.memory_space<smem>>
    %291 = vector.broadcast %290 : f32 to vector<1x128xf32>
    %292 = arith.mulf %291, %289 : vector<1x128xf32>
    %293 = arith.addf %276, %292 : vector<1x128xf32>
    %c37 = arith.constant 37 : index
    %294 = memref.load %arg1[%c37] : memref<84xf32, #tpu.memory_space<smem>>
    %295 = vector.broadcast %294 : f32 to vector<1x128xf32>
    %296 = arith.mulf %295, %289 : vector<1x128xf32>
    %297 = arith.addf %280, %296 : vector<1x128xf32>
    %c57 = arith.constant 57 : index
    %298 = memref.load %arg1[%c57] : memref<84xf32, #tpu.memory_space<smem>>
    %299 = vector.broadcast %298 : f32 to vector<1x128xf32>
    %300 = arith.mulf %299, %289 : vector<1x128xf32>
    %301 = arith.addf %284, %300 : vector<1x128xf32>
    %c77 = arith.constant 77 : index
    %302 = memref.load %arg1[%c77] : memref<84xf32, #tpu.memory_space<smem>>
    %303 = vector.broadcast %302 : f32 to vector<1x128xf32>
    %304 = arith.mulf %303, %289 : vector<1x128xf32>
    %305 = arith.addf %288, %304 : vector<1x128xf32>
    %306 = arith.mulf %7, %5 : vector<1x128xf32>
    %c18 = arith.constant 18 : index
    %307 = memref.load %arg1[%c18] : memref<84xf32, #tpu.memory_space<smem>>
    %308 = vector.broadcast %307 : f32 to vector<1x128xf32>
    %309 = arith.mulf %308, %306 : vector<1x128xf32>
    %310 = arith.addf %293, %309 : vector<1x128xf32>
    %c38 = arith.constant 38 : index
    %311 = memref.load %arg1[%c38] : memref<84xf32, #tpu.memory_space<smem>>
    %312 = vector.broadcast %311 : f32 to vector<1x128xf32>
    %313 = arith.mulf %312, %306 : vector<1x128xf32>
    %314 = arith.addf %297, %313 : vector<1x128xf32>
    %c58 = arith.constant 58 : index
    %315 = memref.load %arg1[%c58] : memref<84xf32, #tpu.memory_space<smem>>
    %316 = vector.broadcast %315 : f32 to vector<1x128xf32>
    %317 = arith.mulf %316, %306 : vector<1x128xf32>
    %318 = arith.addf %301, %317 : vector<1x128xf32>
    %c78 = arith.constant 78 : index
    %319 = memref.load %arg1[%c78] : memref<84xf32, #tpu.memory_space<smem>>
    %320 = vector.broadcast %319 : f32 to vector<1x128xf32>
    %321 = arith.mulf %320, %306 : vector<1x128xf32>
    %322 = arith.addf %305, %321 : vector<1x128xf32>
    %323 = arith.mulf %7, %7 : vector<1x128xf32>
    %c19 = arith.constant 19 : index
    %324 = memref.load %arg1[%c19] : memref<84xf32, #tpu.memory_space<smem>>
    %325 = vector.broadcast %324 : f32 to vector<1x128xf32>
    %326 = arith.mulf %325, %323 : vector<1x128xf32>
    %327 = arith.addf %310, %326 : vector<1x128xf32>
    %c39 = arith.constant 39 : index
    %328 = memref.load %arg1[%c39] : memref<84xf32, #tpu.memory_space<smem>>
    %329 = vector.broadcast %328 : f32 to vector<1x128xf32>
    %330 = arith.mulf %329, %323 : vector<1x128xf32>
    %331 = arith.addf %314, %330 : vector<1x128xf32>
    %c59 = arith.constant 59 : index
    %332 = memref.load %arg1[%c59] : memref<84xf32, #tpu.memory_space<smem>>
    %333 = vector.broadcast %332 : f32 to vector<1x128xf32>
    %334 = arith.mulf %333, %323 : vector<1x128xf32>
    %335 = arith.addf %318, %334 : vector<1x128xf32>
    %c79 = arith.constant 79 : index
    %336 = memref.load %arg1[%c79] : memref<84xf32, #tpu.memory_space<smem>>
    %337 = vector.broadcast %336 : f32 to vector<1x128xf32>
    %338 = arith.mulf %337, %323 : vector<1x128xf32>
    %339 = arith.addf %322, %338 : vector<1x128xf32>
    %c80 = arith.constant 80 : index
    %340 = memref.load %arg1[%c80] : memref<84xf32, #tpu.memory_space<smem>>
    %341 = vector.broadcast %340 : f32 to vector<1x128xf32>
    %342 = arith.addf %327, %341 : vector<1x128xf32>
    %c0_12 = arith.constant 0 : index
    %c0_13 = arith.constant 0 : index
    %c0_14 = arith.constant 0 : index
    %343 = vector.load %arg3[%c0_12, %c0_13, %c0_14] : memref<4x1x128xf32, #tpu.memory_space<vmem>>, vector<1x1x128xf32>
    %344 = vector.shape_cast %343 : vector<1x1x128xf32> to vector<1x128xf32>
    %345 = vector.shape_cast %342 : vector<1x128xf32> to vector<1x1x128xf32>
    tpu.vector_store %arg3[%c0_12, %c0_13, %c0_14], %345 {strides = array<i32>} : memref<4x1x128xf32, #tpu.memory_space<vmem>>, vector<1x1x128xf32>,
    %c81 = arith.constant 81 : index
    %346 = memref.load %arg1[%c81] : memref<84xf32, #tpu.memory_space<smem>>
    %347 = vector.broadcast %346 : f32 to vector<1x128xf32>
    %348 = arith.addf %331, %347 : vector<1x128xf32>
    %c1_15 = arith.constant 1 : index
    %c0_16 = arith.constant 0 : index
    %c0_17 = arith.constant 0 : index
    %349 = vector.load %arg3[%c1_15, %c0_16, %c0_17] : memref<4x1x128xf32, #tpu.memory_space<vmem>>, vector<1x1x128xf32>
    %350 = vector.shape_cast %349 : vector<1x1x128xf32> to vector<1x128xf32>
    %351 = vector.shape_cast %348 : vector<1x128xf32> to vector<1x1x128xf32>
    tpu.vector_store %arg3[%c1_15, %c0_16, %c0_17], %351 {strides = array<i32>} : memref<4x1x128xf32, #tpu.memory_space<vmem>>, vector<1x1x128xf32>,
    %c82 = arith.constant 82 : index
    %352 = memref.load %arg1[%c82] : memref<84xf32, #tpu.memory_space<smem>>
    %353 = vector.broadcast %352 : f32 to vector<1x128xf32>
    %354 = arith.addf %335, %353 : vector<1x128xf32>
    %cst = arith.constant -2.000000e+01 : f32
    %cst_18 = arith.constant 2.000000e+00 : f32
    %355 = vector.broadcast %cst : f32 to vector<1x128xf32>
    %356 = arith.maximumf %355, %354 : vector<1x128xf32>
    %357 = vector.broadcast %cst_18 : f32 to vector<1x128xf32>
    %358 = arith.minimumf %357, %356 : vector<1x128xf32>
    %359 = math.exp %358 : vector<1x128xf32>
    %c2_19 = arith.constant 2 : index
    %c0_20 = arith.constant 0 : index
    %c0_21 = arith.constant 0 : index
    %360 = vector.load %arg3[%c2_19, %c0_20, %c0_21] : memref<4x1x128xf32, #tpu.memory_space<vmem>>, vector<1x1x128xf32>
    %361 = vector.shape_cast %360 : vector<1x1x128xf32> to vector<1x128xf32>
    %362 = vector.shape_cast %359 : vector<1x128xf32> to vector<1x1x128xf32>
    tpu.vector_store %arg3[%c2_19, %c0_20, %c0_21], %362 {strides = array<i32>} : memref<4x1x128xf32, #tpu.memory_space<vmem>>, vector<1x1x128xf32>,
    %c83 = arith.constant 83 : index
    %363 = memref.load %arg1[%c83] : memref<84xf32, #tpu.memory_space<smem>>
    %364 = vector.broadcast %363 : f32 to vector<1x128xf32>
    %365 = arith.addf %339, %364 : vector<1x128xf32>
    %cst_22 = arith.constant -2.000000e+01 : f32
    %cst_23 = arith.constant 2.000000e+00 : f32
    %366 = vector.broadcast %cst_22 : f32 to vector<1x128xf32>
    %367 = arith.maximumf %366, %365 : vector<1x128xf32>
    %368 = vector.broadcast %cst_23 : f32 to vector<1x128xf32>
    %369 = arith.minimumf %368, %367 : vector<1x128xf32>
    %370 = math.exp %369 : vector<1x128xf32>
    %c3_24 = arith.constant 3 : index
    %c0_25 = arith.constant 0 : index
    %c0_26 = arith.constant 0 : index
    %371 = vector.load %arg3[%c3_24, %c0_25, %c0_26] : memref<4x1x128xf32, #tpu.memory_space<vmem>>, vector<1x1x128xf32>
    %372 = vector.shape_cast %371 : vector<1x1x128xf32> to vector<1x128xf32>
    %373 = vector.shape_cast %370 : vector<1x128xf32> to vector<1x1x128xf32>
    tpu.vector_store %arg3[%c3_24, %c0_25, %c0_26], %373 {strides = array<i32>} : memref<4x1x128xf32, #tpu.memory_space<vmem>>, vector<1x1x128xf32>,
    return
  }
  func.func @transform_0(%arg0: i32) -> i32 {
    %c0_i32 = arith.constant 0 : i32
    %c0_i32_0 = arith.constant 0 : i32
    return %c0_i32 : i32
  }
  func.func @transform_1(%arg0: i32) -> (i32, i32, i32) {
    %c0_i32 = arith.constant 0 : i32
    %c0_i32_0 = arith.constant 0 : i32
    %c0_i32_1 = arith.constant 0 : i32
    return %c0_i32, %arg0, %c0_i32_0 : i32, i32, i32
  }
  func.func @transform_2(%arg0: i32) -> (i32, i32, i32) {
    %c0_i32 = arith.constant 0 : i32
    %c0_i32_0 = arith.constant 0 : i32
    %c0_i32_1 = arith.constant 0 : i32
    return %c0_i32, %arg0, %c0_i32_0 : i32, i32, i32
  }
}

</mosaic_0001>

<bundles_post_ra>
// kernel: tpu_custom_call.1
= control target key start
LH: loop header
LB: loop body
LE: loop exit
PB: predicated region body
PF: predicated region fallthrough
CT: control target
= control target key end

     0   :  { %7 = vsyncpa [#allocation5], 0  ;;  %s707_s0 = inlined_call_operand.hbm [shape: f32[84], index: 0, kind: input, shape index: {}]   ;;  %s708_s1 = inlined_call_operand.hbm [shape: f32[4,1,128], index: 1, kind: input, shape index: {}]   ;;  %s709_s2 = inlined_call_operand.hbm [shape: f32[4,1,128], index: 2, kind: output, shape index: {}]  }
   0x1   :  { %8 = vsyncpa [#allocation3], 0 }
   0x2   :  { %9 = vsyncpa [#allocation4], 0  ;;  %s15_s11 = sshll.u32 %s707_s0, 4  ;;  %s23_s14 = sshll.u32 %s708_s1, 4  ;;  %s16_s11 = int_to_ptr.hbm [resolvable:$true] %s15_s11  ;;  %s24_s14 = int_to_ptr.hbm [resolvable:$true] %s23_s14 }
   0x3   :  { %s579_s15 = smov [#allocation2]   ;;  %s580_s16 = smov [#allocation6]  }
   0x4   :  { %18 = dma.hbm_to_smem %s16_s11, 16, %s579_s15, [#allocation5]  }
   0x5   :  { %s25_s17 = sshll.u32 %s580_s16, 4  ;;  %s581_s18 = smov 16   ;;  %s26_s17 = int_to_ptr.vmem [resolvable:$true] %s25_s17 }
   0x6   :  { %s582_s19 = smov 1  }
   0x7   :  { %31 = dma.hbm_to_vmem [thread:$0]  %s24_s14, 64, %s26_s17, [#allocation3], %s581_s18, %s581_s18, %s582_s19  }
   0x8   :  { %573 = dma.done.wait [#allocation5], 16  }
   0x9   :  { %574 = vsyncadd [#allocation5], 4294967280 }
   0xa   :  { %575 = dma.done.wait [#allocation3], 64  }
   0xb   :  { %576 = vsyncadd [#allocation3], 4294967232 }
   0xc   :  { %40 = sfence }
   0xd   :  { %s48_s0 = sld [smem:[#allocation2]]  ;;  %v41_v0 = vld [vmem:[#allocation6] sm:$0x1]  ;;  %v608_v7 = vld [vmem:[#allocation6 + $0x1] sm:$0x1] }
   0xe   :  { %s421_s20 = sld [smem:[#allocation2 + $0x14]]  ;;  %v60_v6 = vmul.f32 %v41_v0, %v41_v0  ;;  %v611_v19 = vmul.f32 %v608_v7, %v41_v0  ;;  %v613_v20 = vld [vmem:[#allocation6 + $0x2] sm:$0x1]  ;;  %v621_v34 = vld [vmem:[#allocation6 + $0x3] sm:$0x1] }
   0xf   :  { %s422_s1 = sld [smem:[#allocation2 + $0x28]]  ;;  %v619_v33 = vmul.f32 %v613_v20, %v41_v0  ;;  %v628_v47 = vmul.f32 %v621_v34, %v41_v0 }
  0x10   :  { %s423_s21 = sld [smem:[#allocation2 + $0x3c]] }
  0x11   :  { %s424_s22 = sld [smem:[#allocation2 + $0x4]] }
  0x12   :  { %s425_s23 = sld [smem:[#allocation2 + $0x18]] }
  0x13   :  { %v49_v1 = vstv %s48_s0  ;;  %s426_s24 = sld [smem:[#allocation2 + $0x2c]] }
  0x14   :  { %v52_v2 = vstv %s421_s20  ;;  %s427_s25 = sld [smem:[#allocation2 + $0x40]]  ;;  %v50_v4 = vmul.f32 %v49_v1, %v41_v0 }
  0x15   :  { %v55_v3 = vstv %s422_s1  ;;  %s428_s26 = sld [smem:[#allocation2 + $0x5]]  ;;  %v53_v8 = vmul.f32 %v52_v2, %v41_v0 }
  0x16   :  { %v58_v5 = vstv %s423_s21  ;;  %s429_s27 = sld [smem:[#allocation2 + $0x19]]  ;;  %v56_v10 = vmul.f32 %v55_v3, %v41_v0 }
  0x17   :  { %v62_v9 = vstv %s424_s22  ;;  %s430_s28 = sld [smem:[#allocation2 + $0x2d]]  ;;  %v59_v13 = vmul.f32 %v58_v5, %v41_v0 }
  0x18   :  { %v63_v11 = vmul.f32 %v62_v9, %v60_v6  ;;  %v66_v12 = vstv %s425_s23  ;;  %s431_s29 = sld [smem:[#allocation2 + $0x41]] }
  0x19   :  { %v67_v14 = vmul.f32 %v66_v12, %v60_v6  ;;  %v70_v15 = vstv %s426_s24  ;;  %s432_s30 = sld [smem:[#allocation2 + $0x6]] }
  0x1a   :  { %v64_v16 = vadd.f32 %v63_v11, %v50_v4  ;;  %v71_v17 = vmul.f32 %v70_v15, %v60_v6  ;;  %v74_v18 = vstv %s427_s25  ;;  %s433_s3 = sld [smem:[#allocation2 + $0x1a]] }
  0x1b   :  { %v68_v21 = vadd.f32 %v67_v14, %v53_v8  ;;  %v75_v22 = vmul.f32 %v74_v18, %v60_v6  ;;  %v79_v23 = vstv %s428_s26  ;;  %s434_s4 = sld [smem:[#allocation2 + $0x2e]] }
  0x1c   :  { %v72_v24 = vadd.f32 %v71_v17, %v56_v10  ;;  %v80_v25 = vmul.f32 %v79_v23, %v611_v19  ;;  %v83_v26 = vstv %s429_s27  ;;  %s435_s5 = sld [smem:[#allocation2 + $0x42]]  ;;  %v160_v23 = vmul.f32 %v608_v7, %v608_v7 }
  0x1d   :  { %v76_v27 = vadd.f32 %v75_v22, %v59_v13  ;;  %v84_v28 = vmul.f32 %v83_v26, %v611_v19  ;;  %v87_v29 = vstv %s430_s28  ;;  %s436_s6 = sld [smem:[#allocation2 + $0x7]] }
  0x1e   :  { %v81_v30 = vadd.f32 %v80_v25, %v64_v16  ;;  %v88_v31 = vmul.f32 %v87_v29, %v611_v19  ;;  %v91_v32 = vstv %s431_s29  ;;  %s437_s7 = sld [smem:[#allocation2 + $0x1b]] }
  0x1f   :  { %v85_v35 = vadd.f32 %v84_v28, %v68_v21  ;;  %v92_v36 = vmul.f32 %v91_v32, %v611_v19  ;;  %v96_v37 = vstv %s432_s30  ;;  %s438_s8 = sld [smem:[#allocation2 + $0x2f]] }
  0x20   :  { %v89_v38 = vadd.f32 %v88_v31, %v72_v24  ;;  %v97_v39 = vmul.f32 %v96_v37, %v619_v33  ;;  %v100_v40 = vstv %s433_s3  ;;  %s439_s9 = sld [smem:[#allocation2 + $0x43]] }
  0x21   :  { %v93_v41 = vadd.f32 %v92_v36, %v76_v27  ;;  %v101_v42 = vmul.f32 %v100_v40, %v619_v33  ;;  %v104_v43 = vstv %s434_s4  ;;  %s440_s10 = sld [smem:[#allocation2 + $0x1]] }
  0x22   :  { %v98_v44 = vadd.f32 %v97_v39, %v81_v30  ;;  %v105_v45 = vmul.f32 %v104_v43, %v619_v33  ;;  %v108_v46 = vstv %s435_s5  ;;  %s441_s11 = sld [smem:[#allocation2 + $0x15]] }
  0x23   :  { %v102_v48 = vadd.f32 %v101_v42, %v85_v35  ;;  %v109_v49 = vmul.f32 %v108_v46, %v619_v33  ;;  %v113_v50 = vstv %s436_s6  ;;  %s442_s12 = sld [smem:[#allocation2 + $0x29]] }
  0x24   :  { %v106_v51 = vadd.f32 %v105_v45, %v89_v38  ;;  %v114_v52 = vmul.f32 %v113_v50, %v628_v47  ;;  %v117_v53 = vstv %s437_s7  ;;  %s443_s13 = sld [smem:[#allocation2 + $0x3d]]  ;;  %v647_v38 = vmul.f32 %v613_v20, %v608_v7 }
  0x25   :  { %v110_v54 = vadd.f32 %v109_v49, %v93_v41  ;;  %v118_v55 = vmul.f32 %v117_v53, %v628_v47  ;;  %v121_v56 = vstv %s438_s8  ;;  %s444_s14 = sld [smem:[#allocation2 + $0x8]] }
  0x26   :  { %v115_v57 = vadd.f32 %v114_v52, %v98_v44  ;;  %v122_v58 = vmul.f32 %v121_v56, %v628_v47  ;;  %v125_v59 = vstv %s439_s9  ;;  %s445_s15 = sld [smem:[#allocation2 + $0x1c]] }
  0x27   :  { %v119_v60 = vadd.f32 %v118_v55, %v102_v48  ;;  %v126_v61 = vmul.f32 %v125_v59, %v628_v47  ;;  %v129_v62 = vstv %s440_s10  ;;  %s446_s16 = sld [smem:[#allocation2 + $0x30]] }
  0x28   :  { %v123_v63 = vadd.f32 %v122_v58, %v106_v51  ;;  %v130_v0 = vmul.f32 %v129_v62, %v608_v7  ;;  %v133_v1 = vstv %s441_s11  ;;  %s447_s17 = sld [smem:[#allocation2 + $0x44]]  ;;  %v654_v51 = vmul.f32 %v621_v34, %v608_v7 }
  0x29   :  { %v127_v2 = vadd.f32 %v126_v61, %v110_v54  ;;  %v134_v3 = vmul.f32 %v133_v1, %v608_v7  ;;  %v137_v4 = vstv %s442_s12  ;;  %s448_s0 = sld [smem:[#allocation2 + $0x9]] }
  0x2a   :  { %v131_v5 = vadd.f32 %v130_v0, %v115_v57  ;;  %v138_v6 = vmul.f32 %v137_v4, %v608_v7  ;;  %v141_v8 = vstv %s443_s13  ;;  %s449_s20 = sld [smem:[#allocation2 + $0x1d]] }
  0x2b   :  { %v135_v9 = vadd.f32 %v134_v3, %v119_v60  ;;  %v142_v10 = vmul.f32 %v141_v8, %v608_v7  ;;  %v145_v11 = vstv %s444_s14  ;;  %s450_s1 = sld [smem:[#allocation2 + $0x31]] }
  0x2c   :  { %v139_v12 = vadd.f32 %v138_v6, %v123_v63  ;;  %v146_v13 = vmul.f32 %v145_v11, %v611_v19  ;;  %v149_v14 = vstv %s445_s15  ;;  %s451_s21 = sld [smem:[#allocation2 + $0x45]] }
  0x2d   :  { %v143_v15 = vadd.f32 %v142_v10, %v127_v2  ;;  %v150_v16 = vmul.f32 %v149_v14, %v611_v19  ;;  %v153_v17 = vstv %s446_s16  ;;  %s452_s22 = sld [smem:[#allocation2 + $0xa]] }
  0x2e   :  { %v147_v18 = vadd.f32 %v146_v13, %v131_v5  ;;  %v154_v21 = vmul.f32 %v153_v17, %v611_v19  ;;  %v157_v22 = vstv %s447_s17  ;;  %s453_s23 = sld [smem:[#allocation2 + $0x1e]] }
  0x2f   :  { %v151_v24 = vadd.f32 %v150_v16, %v135_v9  ;;  %v158_v25 = vmul.f32 %v157_v22, %v611_v19  ;;  %v162_v26 = vstv %s448_s0  ;;  %s454_s24 = sld [smem:[#allocation2 + $0x32]] }
  0x30   :  { %v155_v27 = vadd.f32 %v154_v21, %v139_v12  ;;  %v163_v28 = vmul.f32 %v162_v26, %v160_v23  ;;  %v166_v29 = vstv %s449_s20  ;;  %s455_s25 = sld [smem:[#allocation2 + $0x46]] }
  0x31   :  { %v159_v30 = vadd.f32 %v158_v25, %v143_v15  ;;  %v167_v31 = vmul.f32 %v166_v29, %v160_v23  ;;  %v170_v32 = vstv %s450_s1  ;;  %s456_s26 = sld [smem:[#allocation2 + $0xb]] }
  0x32   :  { %v164_v35 = vadd.f32 %v163_v28, %v147_v18  ;;  %v171_v36 = vmul.f32 %v170_v32, %v160_v23  ;;  %v174_v37 = vstv %s451_s21  ;;  %s457_s27 = sld [smem:[#allocation2 + $0x1f]] }
  0x33   :  { %v168_v39 = vadd.f32 %v167_v31, %v151_v24  ;;  %v175_v19 = vmul.f32 %v174_v37, %v160_v23  ;;  %v179_v40 = vstv %s452_s22  ;;  %s458_s28 = sld [smem:[#allocation2 + $0x33]] }
  0x34   :  { %v172_v41 = vadd.f32 %v171_v36, %v155_v27  ;;  %v180_v42 = vmul.f32 %v179_v40, %v647_v38  ;;  %v183_v43 = vstv %s453_s23  ;;  %s459_s29 = sld [smem:[#allocation2 + $0x47]]  ;;  %v259_v40 = vmul.f32 %v613_v20, %v613_v20 }
  0x35   :  { %v176_v44 = vadd.f32 %v175_v19, %v159_v30  ;;  %v184_v45 = vmul.f32 %v183_v43, %v647_v38  ;;  %v187_v46 = vstv %s454_s24  ;;  %s460_s30 = sld [smem:[#allocation2 + $0x2]] }
  0x36   :  { %v181_v48 = vadd.f32 %v180_v42, %v164_v35  ;;  %v188_v49 = vmul.f32 %v187_v46, %v647_v38  ;;  %v191_v50 = vstv %s455_s25  ;;  %s461_s3 = sld [smem:[#allocation2 + $0x16]] }
  0x37   :  { %v185_v52 = vadd.f32 %v184_v45, %v168_v39  ;;  %v192_v53 = vmul.f32 %v191_v50, %v647_v38  ;;  %v196_v54 = vstv %s456_s26  ;;  %s462_s4 = sld [smem:[#allocation2 + $0x2a]] }
  0x38   :  { %v189_v55 = vadd.f32 %v188_v49, %v172_v41  ;;  %v197_v56 = vmul.f32 %v196_v54, %v654_v51  ;;  %v200_v57 = vstv %s457_s27  ;;  %s463_s5 = sld [smem:[#allocation2 + $0x3e]]  ;;  %v677_v54 = vmul.f32 %v621_v34, %v613_v20 }
  0x39   :  { %v193_v58 = vadd.f32 %v192_v53, %v176_v44  ;;  %v201_v59 = vmul.f32 %v200_v57, %v654_v51  ;;  %v204_v60 = vstv %s458_s28  ;;  %s464_s6 = sld [smem:[#allocation2 + $0xc]] }
  0x3a   :  { %v198_v61 = vadd.f32 %v197_v56, %v181_v48  ;;  %v205_v7 = vmul.f32 %v204_v60, %v654_v51  ;;  %v208_v62 = vstv %s459_s29  ;;  %s465_s7 = sld [smem:[#allocation2 + $0x20]] }
  0x3b   :  { %v202_v63 = vadd.f32 %v201_v59, %v185_v52  ;;  %v209_v0 = vmul.f32 %v208_v62, %v654_v51  ;;  %v212_v1 = vstv %s460_s30  ;;  %s466_s8 = sld [smem:[#allocation2 + $0x34]] }
  0x3c   :  { %v206_v2 = vadd.f32 %v205_v7, %v189_v55  ;;  %v213_v3 = vmul.f32 %v212_v1, %v613_v20  ;;  %v216_v4 = vstv %s461_s3  ;;  %s467_s9 = sld [smem:[#allocation2 + $0x48]] }
  0x3d   :  { %v210_v5 = vadd.f32 %v209_v0, %v193_v58  ;;  %v217_v6 = vmul.f32 %v216_v4, %v613_v20  ;;  %v220_v8 = vstv %s462_s4  ;;  %s468_s10 = sld [smem:[#allocation2 + $0xd]] }
  0x3e   :  { %v214_v9 = vadd.f32 %v213_v3, %v198_v61  ;;  %v221_v10 = vmul.f32 %v220_v8, %v613_v20  ;;  %v224_v11 = vstv %s463_s5  ;;  %s469_s11 = sld [smem:[#allocation2 + $0x21]] }
  0x3f   :  { %v218_v12 = vadd.f32 %v217_v6, %v202_v63  ;;  %v225_v13 = vmul.f32 %v224_v11, %v613_v20  ;;  %v228_v14 = vstv %s464_s6  ;;  %s470_s12 = sld [smem:[#allocation2 + $0x35]] }
  0x40   :  { %v222_v15 = vadd.f32 %v221_v10, %v206_v2  ;;  %v229_v16 = vmul.f32 %v228_v14, %v619_v33  ;;  %v232_v17 = vstv %s465_s7  ;;  %s471_s13 = sld [smem:[#allocation2 + $0x49]] }
  0x41   :  { %v226_v18 = vadd.f32 %v225_v13, %v210_v5  ;;  %v233_v21 = vmul.f32 %v232_v17, %v619_v33  ;;  %v236_v22 = vstv %s466_s8  ;;  %s472_s14 = sld [smem:[#allocation2 + $0xe]] }
  0x42   :  { %v230_v23 = vadd.f32 %v229_v16, %v214_v9  ;;  %v237_v24 = vmul.f32 %v236_v22, %v619_v33  ;;  %v240_v25 = vstv %s467_s9  ;;  %s473_s15 = sld [smem:[#allocation2 + $0x22]] }
  0x43   :  { %v234_v26 = vadd.f32 %v233_v21, %v218_v12  ;;  %v241_v27 = vmul.f32 %v240_v25, %v619_v33  ;;  %v244_v28 = vstv %s468_s10  ;;  %s474_s16 = sld [smem:[#allocation2 + $0x36]] }
  0x44   :  { %v238_v29 = vadd.f32 %v237_v24, %v222_v15  ;;  %v245_v30 = vmul.f32 %v244_v28, %v647_v38  ;;  %v248_v31 = vstv %s469_s11  ;;  %s475_s17 = sld [smem:[#allocation2 + $0x4a]] }
  0x45   :  { %v242_v32 = vadd.f32 %v241_v27, %v226_v18  ;;  %v249_v35 = vmul.f32 %v248_v31, %v647_v38  ;;  %v252_v36 = vstv %s470_s12  ;;  %s476_s0 = sld [smem:[#allocation2 + $0xf]] }
  0x46   :  { %v246_v37 = vadd.f32 %v245_v30, %v230_v23  ;;  %v253_v39 = vmul.f32 %v252_v36, %v647_v38  ;;  %v256_v19 = vstv %s471_s13  ;;  %s477_s20 = sld [smem:[#allocation2 + $0x23]] }
  0x47   :  { %v250_v33 = vadd.f32 %v249_v35, %v234_v26  ;;  %v257_v41 = vmul.f32 %v256_v19, %v647_v38  ;;  %v261_v42 = vstv %s472_s14  ;;  %s478_s1 = sld [smem:[#allocation2 + $0x37]] }
  0x48   :  { %v254_v43 = vadd.f32 %v253_v39, %v238_v29  ;;  %v262_v44 = vmul.f32 %v261_v42, %v259_v40  ;;  %v265_v45 = vstv %s473_s15  ;;  %s479_s21 = sld [smem:[#allocation2 + $0x4b]] }
  0x49   :  { %v258_v46 = vadd.f32 %v257_v41, %v242_v32  ;;  %v266_v48 = vmul.f32 %v265_v45, %v259_v40  ;;  %v269_v49 = vstv %s474_s16  ;;  %s480_s22 = sld [smem:[#allocation2 + $0x3]] }
  0x4a   :  { %v263_v50 = vadd.f32 %v262_v44, %v246_v37  ;;  %v270_v52 = vmul.f32 %v269_v49, %v259_v40  ;;  %v273_v53 = vstv %s475_s17  ;;  %s481_s23 = sld [smem:[#allocation2 + $0x17]] }
  0x4b   :  { %v267_v55 = vadd.f32 %v266_v48, %v250_v33  ;;  %v274_v38 = vmul.f32 %v273_v53, %v259_v40  ;;  %v278_v56 = vstv %s476_s0  ;;  %s482_s24 = sld [smem:[#allocation2 + $0x2b]]  ;;  %v357_v53 = vmul.f32 %v621_v34, %v621_v34  ;;  %s583_s0 = smov [#allocation7]  }
  0x4c   :  { %v271_v57 = vadd.f32 %v270_v52, %v254_v43  ;;  %v279_v58 = vmul.f32 %v278_v56, %v677_v54  ;;  %v282_v59 = vstv %s477_s20  ;;  %s483_s25 = sld [smem:[#allocation2 + $0x3f]]  ;;  %s405_s20 = sshll.u32 %s583_s0, 4  ;;  %s406_s20 = int_to_ptr.vmem [resolvable:$true] %s405_s20 }
  0x4d   :  { %v275_v60 = vadd.f32 %v274_v38, %v258_v46  ;;  %v283_v61 = vmul.f32 %v282_v59, %v677_v54  ;;  %v286_v7 = vstv %s478_s1  ;;  %s484_s26 = sld [smem:[#allocation2 + $0x10]] }
  0x4e   :  { %v280_v62 = vadd.f32 %v279_v58, %v263_v50  ;;  %v287_v63 = vmul.f32 %v286_v7, %v677_v54  ;;  %v290_v20 = vstv %s479_s21  ;;  %s485_s27 = sld [smem:[#allocation2 + $0x24]] }
  0x4f   :  { %v284_v0 = vadd.f32 %v283_v61, %v267_v55  ;;  %v291_v1 = vmul.f32 %v290_v20, %v677_v54  ;;  %v294_v2 = vstv %s480_s22  ;;  %s486_s28 = sld [smem:[#allocation2 + $0x38]]  ;;  %s407_s22 = sshll.u32 %s709_s2, 4  ;;  %s408_s22 = int_to_ptr.hbm [resolvable:$true] %s407_s22 }
  0x50   :  { %v288_v3 = vadd.f32 %v287_v63, %v271_v57  ;;  %v295_v4 = vmul.f32 %v294_v2, %v621_v34  ;;  %v298_v5 = vstv %s481_s23  ;;  %s487_s29 = sld [smem:[#allocation2 + $0x4c]] }
  0x51   :  { %v292_v6 = vadd.f32 %v291_v1, %v275_v60  ;;  %v299_v8 = vmul.f32 %v298_v5, %v621_v34  ;;  %v302_v9 = vstv %s482_s24  ;;  %s488_s30 = sld [smem:[#allocation2 + $0x11]] }
  0x52   :  { %v296_v10 = vadd.f32 %v295_v4, %v280_v62  ;;  %v303_v11 = vmul.f32 %v302_v9, %v621_v34  ;;  %v306_v12 = vstv %s483_s25  ;;  %s489_s3 = sld [smem:[#allocation2 + $0x25]] }
  0x53   :  { %v300_v13 = vadd.f32 %v299_v8, %v284_v0  ;;  %v307_v14 = vmul.f32 %v306_v12, %v621_v34  ;;  %v310_v15 = vstv %s484_s26  ;;  %s490_s4 = sld [smem:[#allocation2 + $0x39]] }
  0x54   :  { %v304_v16 = vadd.f32 %v303_v11, %v288_v3  ;;  %v311_v17 = vmul.f32 %v310_v15, %v628_v47  ;;  %v314_v18 = vstv %s485_s27  ;;  %s491_s5 = sld [smem:[#allocation2 + $0x4d]] }
  0x55   :  { %v308_v21 = vadd.f32 %v307_v14, %v292_v6  ;;  %v315_v22 = vmul.f32 %v314_v18, %v628_v47  ;;  %v318_v23 = vstv %s486_s28  ;;  %s492_s6 = sld [smem:[#allocation2 + $0x12]] }
  0x56   :  { %v312_v24 = vadd.f32 %v311_v17, %v296_v10  ;;  %v319_v25 = vmul.f32 %v318_v23, %v628_v47  ;;  %v322_v26 = vstv %s487_s29  ;;  %s493_s7 = sld [smem:[#allocation2 + $0x26]] }
  0x57   :  { %v316_v27 = vadd.f32 %v315_v22, %v300_v13  ;;  %v323_v28 = vmul.f32 %v322_v26, %v628_v47  ;;  %v326_v29 = vstv %s488_s30  ;;  %s494_s8 = sld [smem:[#allocation2 + $0x3a]] }
  0x58   :  { %v320_v30 = vadd.f32 %v319_v25, %v304_v16  ;;  %v327_v31 = vmul.f32 %v326_v29, %v654_v51  ;;  %v330_v32 = vstv %s489_s3  ;;  %s495_s9 = sld [smem:[#allocation2 + $0x4e]] }
  0x59   :  { %v324_v35 = vadd.f32 %v323_v28, %v308_v21  ;;  %v331_v36 = vmul.f32 %v330_v32, %v654_v51  ;;  %v334_v37 = vstv %s490_s4  ;;  %s496_s10 = sld [smem:[#allocation2 + $0x13]] }
  0x5a   :  { %v328_v39 = vadd.f32 %v327_v31, %v312_v24  ;;  %v335_v19 = vmul.f32 %v334_v37, %v654_v51  ;;  %v338_v40 = vstv %s491_s5  ;;  %s497_s11 = sld [smem:[#allocation2 + $0x27]] }
  0x5b   :  { %v332_v33 = vadd.f32 %v331_v36, %v316_v27  ;;  %v339_v47 = vmul.f32 %v338_v40, %v654_v51  ;;  %v342_v41 = vstv %s492_s6  ;;  %s498_s12 = sld [smem:[#allocation2 + $0x3b]] }
  0x5c   :  { %v336_v42 = vadd.f32 %v335_v19, %v320_v30  ;;  %v343_v43 = vmul.f32 %v342_v41, %v677_v54  ;;  %v346_v44 = vstv %s493_s7  ;;  %s499_s13 = sld [smem:[#allocation2 + $0x4f]] }
  0x5d   :  { %v340_v45 = vadd.f32 %v339_v47, %v324_v35  ;;  %v347_v46 = vmul.f32 %v346_v44, %v677_v54  ;;  %v350_v48 = vstv %s494_s8  ;;  %s500_s14 = sld [smem:[#allocation2 + $0x50]] }
  0x5e   :  { %v344_v49 = vadd.f32 %v343_v43, %v328_v39  ;;  %v351_v50 = vmul.f32 %v350_v48, %v677_v54  ;;  %v354_v52 = vstv %s495_s9  ;;  %s501_s15 = sld [smem:[#allocation2 + $0x51]] }
  0x5f   :  { %v348_v51 = vadd.f32 %v347_v46, %v332_v33  ;;  %v355_v55 = vmul.f32 %v354_v52, %v677_v54  ;;  %v359_v38 = vstv %s496_s10  ;;  %s502_s16 = sld [smem:[#allocation2 + $0x52]] }
  0x60   :  { %v352_v56 = vadd.f32 %v351_v50, %v336_v42  ;;  %v360_v57 = vmul.f32 %v359_v38, %v357_v53  ;;  %v363_v58 = vstv %s497_s11  ;;  %s503_s17 = sld [smem:[#allocation2 + $0x53]] }
  0x61   :  { %v356_v59 = vadd.f32 %v355_v55, %v340_v45  ;;  %v364_v60 = vmul.f32 %v363_v58, %v357_v53  ;;  %v367_v61 = vstv %s498_s12 }
  0x62   :  { %v361_v7 = vadd.f32 %v360_v57, %v344_v49  ;;  %v368_v62 = vmul.f32 %v367_v61, %v357_v53  ;;  %v371_v63 = vstv %s499_s13 }
  0x63   :  { %v365_v20 = vadd.f32 %v364_v60, %v348_v51  ;;  %v372_v0 = vmul.f32 %v371_v63, %v357_v53  ;;  %v375_v1 = vstv %s500_s14 }
  0x64   :  { %v369_v34 = vadd.f32 %v368_v62, %v352_v56  ;;  %v376_v2 = vadd.f32 %v375_v1, %v361_v7  ;;  %v379_v3 = vstv %s501_s15 }
  0x65   :  { %v373_v4 = vadd.f32 %v372_v0, %v356_v59  ;;  %v380_v54 = vadd.f32 %v379_v3, %v365_v20  ;;  %v384_v5 = vstv %s502_s16 }
  0x66   :  { %377 = vst [vmem:[#allocation7] sm:$0x1] %v376_v2  ;;  %v385_v6 = vadd.f32 %v384_v5, %v369_v34  ;;  %v393_v8 = vstv %s503_s17 }
  0x67   :  { %382 = vst [vmem:[#allocation7 + $0x1] sm:$0x1] %v380_v54  ;;  %v394_v9 = vadd.f32 %v393_v8, %v373_v4 }
  0x68   :  { %v386_v10 = vmax.f32 %v385_v6, -20.0 }
  0x69   :  { %v395_v11 = vmax.f32 %v394_v9, -20.0 }
  0x6a   :  { %v387_v12 = vmin.f32 %v386_v10, 2.0 }
  0x6b   :  { %v396_v13 = vmin.f32 %v395_v11, 2.0 }
  0x6c   :  { %v388_v14 = vmul.f32 1.442695, %v387_v12 }
  0x6d   :  { %v397_v15 = vmul.f32 1.442695, %v396_v13 }
  0x6e   :  { %509 = vpow2.f32 %v388_v14 }
  0x6f   :  { %511 = vpow2.f32 %v397_v15 }
  0x74   :  { %v510_v16 = vpop.eup %509 }
  0x75   :  { %v512_v17 = vpop.eup %511  ;;  %391 = vst [vmem:[#allocation7 + $0x2] sm:$0x1] %v510_v16 }
  0x76   :  { %400 = vst [vmem:[#allocation7 + $0x3] sm:$0x1] %v512_v17 }
  0x77   :  { %413 = dma.vmem_to_hbm [thread:$0]  %s406_s20, 64, %s408_s22, [#allocation4], %s581_s18, %s581_s18, %s582_s19  }
  0x78   :  { %577 = dma.done.wait [#allocation4], 64  }
  0x79   :  { %578 = vsyncadd [#allocation4], 4294967232 }
  0x7a   :  { %418 = vsyncpa [#allocation3], 1 }
  0x7b   :  { %419 = vsyncpa [#allocation4], 1 }
  0x7c   :  { %420 = vsyncpa [#allocation5], 1 }

</bundles_post_ra>
